<compile_context>
chip_gen: v7x
topology: tpu7x:2x2x1
jax: 0.10.0
libtpu: 0.0.40
codegen_flags: <defaults>
</compile_context>

<pallas_src>
import functools

import jax
import jax.numpy as jnp
from jax.experimental import pallas as pl
from jax.experimental.pallas import tpu as pltpu

N_PROTO = 3          # EntModel hard-codes protos.view(3, 768)
D = 768


# ---------------------------------------------------------------------------
# Parameter preparation (one-time): keep W resident in HBM as bf16.
# ---------------------------------------------------------------------------
def prepare_ent_weights(W):
    """One-time conversion of the (768,768) parameter W to bf16.

    Do this once at model-setup time, NOT per forward call (a per-call cast in
    the jit wrapper would add an HBM round-trip and defeat the purpose).
    """
    return jnp.asarray(W, jnp.bfloat16)


def _n_chunks_for_device() -> int:
    """Coarse chunk count for W's column dimension.

    v5e/v6e (lower HBM BW): 2 chunks -> overlap W DMA with the MXU pass.
    v7x / unknown: 1 chunk -> per-step grid overhead would exceed the DMA.
    """
    try:
        kind = jax.devices()[0].device_kind.lower()
    except Exception:
        return 1
    if "7" in kind:
        return 1
    if any(t in kind for t in ("v2", "v3", "v4", "v5", "v6")):
        return 2
    return 1


# ---------------------------------------------------------------------------
# Single word_vec kernel (matches EntModel.forward exactly).
# ---------------------------------------------------------------------------
def ent_kernel(protos_ref, w_ref, wv_ref, o_ref):
    """One column-chunk of softmax(protos @ W @ word_vec).

    protos_ref : VMEM (3, 768)  f32   prototypes (grid-invariant block)
    w_ref      : VMEM (768, TN) bf16  column chunk of W
    wv_ref     : VMEM (1, TN)   f32   matching chunk of word_vec (lane-dense row)
    o_ref      : VMEM (3, 1)    f32   logit accumulator; softmax written at the end
    """
    j = pl.program_id(0)

    @pl.when(j == 0)
    def _init():
        o_ref[...] = jnp.zeros_like(o_ref)

    # inp1 chunk = protos @ W[:, chunk] : native bf16 MXU matmul, f32 accumulation.
    h = jnp.dot(protos_ref[...].astype(jnp.bfloat16), w_ref[...],
                preferred_element_type=jnp.float32)                  # (3, TN)

    # Partial inp2 = sum over this lane chunk of inp1 * word_vec (lane reduction,
    # stays lane-dense instead of a (TN,1) matmul).
    o_ref[...] += jnp.sum(h * wv_ref[...], axis=1, keepdims=True)    # (3, 1)

    @pl.when(j == pl.num_programs(0) - 1)
    def _finalize():
        logits = o_ref[...]                                          # (3, 1)
        m = jnp.max(logits, axis=0, keepdims=True)
        e = jnp.exp(logits - m)
        o_ref[...] = e / jnp.sum(e, axis=0, keepdims=True)


@functools.partial(jax.jit, static_argnums=(3,))
def _ent_forward(protos, w_bf16, word_vec, n_chunks):
    protos = jnp.reshape(protos, (N_PROTO, D)).astype(jnp.float32)
    wv_row = jnp.reshape(word_vec, (1, D)).astype(jnp.float32)
    tn = D // n_chunks

    cost = pl.CostEstimate(
        flops=2 * N_PROTO * D * D + 2 * N_PROTO * D,
        transcendentals=N_PROTO,
        bytes_accessed=D * D * 2 + N_PROTO * D * 4 + D * 4 + N_PROTO * 4,
    )

    return pl.pallas_call(
        ent_kernel,
        out_shape=jax.ShapeDtypeStruct((N_PROTO, 1), jnp.float32),
        grid=(n_chunks,),
        in_specs=[
            pl.BlockSpec((N_PROTO, D), lambda j: (0, 0)),   # protos (invariant)
            pl.BlockSpec((D, tn), lambda j: (0, j)),        # W column chunk (bf16)
            pl.BlockSpec((1, tn), lambda j: (0, j)),        # word_vec chunk
        ],
        out_specs=pl.BlockSpec((N_PROTO, 1), lambda j: (0, 0)),
        compiler_params=pltpu.CompilerParams(
            dimension_semantics=("arbitrary",)),
        cost_estimate=cost,
    )(protos, w_bf16, wv_row)


def ent_model_forward(protos, W, word_vec, training=False):
    """JAX wrapper reproducing EntModel.forward(protos, word_vec, training).

    protos   : any shape that views to (3, 768)
    W        : (768, 768); pass the bf16 copy from prepare_ent_weights() to
               avoid a per-call cast (f32 is accepted but casts each call)
    word_vec : any shape that views to (768, 1)
    training : accepted for API parity; EntModel.forward never uses it
    returns  : (3, 1) softmax probabilities over the 3 prototypes
    """
    del training  # unused by the module (no dropout / BN in EntModel)
    if W.dtype != jnp.bfloat16:
        W = prepare_ent_weights(W)
    return _ent_forward(protos, W, word_vec, _n_chunks_for_device())


# ---------------------------------------------------------------------------
# Batched variant: many word_vecs against the same W in one call (amortizes
# the W DMA and the per-call launch overhead; second contraction on the MXU).
# ---------------------------------------------------------------------------
def ent_batched_kernel(protos_ref, w_ref, wvt_ref, o_ref):
    """softmax_columns(protos @ W @ WV), WV = (768, B), all in one VMEM block."""
    h = jnp.dot(protos_ref[...].astype(jnp.bfloat16), w_ref[...],
                preferred_element_type=jnp.float32)                  # (3, 768)
    logits = jnp.dot(h.astype(jnp.bfloat16), wvt_ref[...],
                     preferred_element_type=jnp.float32)             # (3, B)
    m = jnp.max(logits, axis=0, keepdims=True)
    e = jnp.exp(logits - m)
    o_ref[...] = e / jnp.sum(e, axis=0, keepdims=True)


@jax.jit
def _ent_forward_batched(protos, w_bf16, wvt_bf16):
    B = wvt_bf16.shape[1]
    cost = pl.CostEstimate(
        flops=2 * N_PROTO * D * D + 2 * N_PROTO * D * B,
        transcendentals=N_PROTO * B,
        bytes_accessed=D * D * 2 + N_PROTO * D * 4 + D * B * 2 + N_PROTO * B * 4,
    )
    return pl.pallas_call(
        ent_batched_kernel,
        out_shape=jax.ShapeDtypeStruct((N_PROTO, B), jnp.float32),
        in_specs=[
            pl.BlockSpec(memory_space=pltpu.MemorySpace.VMEM),
            pl.BlockSpec(memory_space=pltpu.MemorySpace.VMEM),
            pl.BlockSpec(memory_space=pltpu.MemorySpace.VMEM),
        ],
        out_specs=pl.BlockSpec(memory_space=pltpu.MemorySpace.VMEM),
        cost_estimate=cost,
    )(protos, w_bf16, wvt_bf16)


def ent_model_forward_batched(protos, W, word_vecs, training=False):
    """Batched EntModel.forward: word_vecs is (768, B); returns (3, B) softmaxes."""
    del training
    if W.dtype != jnp.bfloat16:
        W = prepare_ent_weights(W)
    protos = jnp.reshape(protos, (N_PROTO, D)).astype(jnp.float32)
    wvt = jnp.reshape(word_vecs, (D, -1)).astype(jnp.bfloat16)
    return _ent_forward_batched(protos, W, wvt)


# ---------------------------------------------------------------------------
# Pure-JAX f32 reference of EntModel.forward.
# ---------------------------------------------------------------------------
def ent_model_reference(protos, W, word_vec):
    hp = jax.lax.Precision.HIGHEST
    inp1 = jnp.dot(jnp.reshape(protos, (N_PROTO, D)),
                   W.astype(jnp.float32), precision=hp)
    inp2 = jnp.dot(inp1, jnp.reshape(word_vec, (D, 1)), precision=hp)
    return jax.nn.softmax(inp2, axis=0)


if __name__ == "__main__":
    key = jax.random.PRNGKey(0)
    k_p, k_w, k_v, k_b = jax.random.split(key, 4)

    protos = jax.random.normal(k_p, (N_PROTO, D), jnp.float32)
    # xavier_normal_ for a (768, 768) matrix: std = sqrt(2 / (768 + 768))
    W = jax.random.normal(k_w, (D, D), jnp.float32) * (2.0 / (D + D)) ** 0.5
    # scale word_vec so the 3 logits land in a non-degenerate softmax range
    word_vec = jax.random.normal(k_v, (D, 1), jnp.float32) * 0.05

    # One-time parameter conversion (halves the dominant W DMA).
    W_bf16 = prepare_ent_weights(W)

    prob = jax.block_until_ready(
        ent_model_forward(protos, W_bf16, word_vec, training=False))
    ref = ent_model_reference(protos, W, word_vec)

    assert prob.shape == (N_PROTO, 1), prob.shape
    # bf16 MXU inputs vs. f32 HIGHEST reference: give a little extra tolerance.
    assert jnp.allclose(prob, ref, atol=5e-3, rtol=5e-3), (prob, ref)
    assert jnp.allclose(jnp.sum(prob), 1.0, atol=1e-5)

    # Batched variant: B word_vecs against the same W in a single pallas_call.
    B = 8
    word_vecs = jax.random.normal(k_b, (D, B), jnp.float32) * 0.05
    probs_b = jax.block_until_ready(
        ent_model_forward_batched(protos, W_bf16, word_vecs))
    ref_b = jnp.concatenate(
        [ent_model_reference(protos, W, word_vecs[:, b:b + 1]) for b in range(B)],
        axis=1)
    assert probs_b.shape == (N_PROTO, B), probs_b.shape
    assert jnp.allclose(probs_b, ref_b, atol=5e-3, rtol=5e-3), (probs_b, ref_b)
    assert jnp.allclose(jnp.sum(probs_b, axis=0), jnp.ones((B,)), atol=1e-5)

    print("KERNEL_OK")
</pallas_src>

<mosaic_0001>
module attributes {stable_mosaic.version = 11 : i64} {
  func.func @ent_kernel(%arg0: i32, %arg1: memref<3x768xf32, #tpu.memory_space<vmem>>, %arg2: memref<768x768xbf16, #tpu.memory_space<vmem>>, %arg3: memref<1x768xf32, #tpu.memory_space<vmem>>, %arg4: memref<3x1xf32, #tpu.memory_space<vmem>>) attributes {dimension_semantics = [#tpu.dimension_semantics<arbitrary>], iteration_bounds = array<i64: 1>, scalar_prefetch = 0 : i64, scratch_operands = 0 : i64, tpu.core_type = #tpu.core_type<tc>, window_params = [{pipeline_mode = #tpu.pipeline_mode<synchronous>, transform_indices = @transform_0, window_bounds = array<i64: 3, 768>}, {transform_indices = @transform_1, window_bounds = array<i64: 768, 768>}, {transform_indices = @transform_2, window_bounds = array<i64: 1, 768>}, {pipeline_mode = #tpu.pipeline_mode<synchronous>, transform_indices = @transform_3, window_bounds = array<i64: 3, 1>}]} {
    %c0_i32 = arith.constant 0 : i32
    %0 = arith.cmpi eq, %arg0, %c0_i32 : i32
    %1 = arith.extui %0 : i1 to i32
    %c0_i32_0 = arith.constant 0 : i32
    %2 = arith.cmpi ne, %1, %c0_i32_0 : i32
    scf.if %2 {
      %cst_13 = arith.constant 0.000000e+00 : f32
      %18 = vector.broadcast %cst_13 : f32 to vector<3x1xf32>
      %c0_14 = arith.constant 0 : index
      %c0_15 = arith.constant 0 : index
      %19 = vector.load %arg4[%c0_14, %c0_15] : memref<3x1xf32, #tpu.memory_space<vmem>>, vector<3x1xf32>
      tpu.vector_store %arg4[%c0_14, %c0_15], %18 {strides = array<i32>} : memref<3x1xf32, #tpu.memory_space<vmem>>, vector<3x1xf32>,
    } else {
    }
    %c0 = arith.constant 0 : index
    %c0_1 = arith.constant 0 : index
    %3 = vector.load %arg1[%c0, %c0_1] : memref<3x768xf32, #tpu.memory_space<vmem>>, vector<3x768xf32>
    %4 = arith.truncf %3 : vector<3x768xf32> to vector<3x768xbf16>
    %c0_2 = arith.constant 0 : index
    %c0_3 = arith.constant 0 : index
    %5 = vector.load %arg2[%c0_2, %c0_3] : memref<768x768xbf16, #tpu.memory_space<vmem>>, vector<768x768xbf16>
    %cst = arith.constant dense<0.000000e+00> : vector<3x768xf32>
    %6 = tpu.matmul %4, %5, %cst {dimension_numbers = #tpu.dot_dimension_numbers<[1], [0], [0], [1], [0, 0, 1, 1], [], []>} : vector<3x768xbf16>, vector<768x768xbf16>, vector<3x768xf32> -> vector<3x768xf32>
    %c0_4 = arith.constant 0 : index
    %c0_5 = arith.constant 0 : index
    %7 = vector.load %arg4[%c0_4, %c0_5] : memref<3x1xf32, #tpu.memory_space<vmem>>, vector<3x1xf32>
    %c0_6 = arith.constant 0 : index
    %c0_7 = arith.constant 0 : index
    %8 = vector.load %arg3[%c0_6, %c0_7] : memref<1x768xf32, #tpu.memory_space<vmem>>, vector<1x768xf32>
    %9 = vector.broadcast %8 : vector<1x768xf32> to vector<3x768xf32>
    %10 = arith.mulf %6, %9 : vector<3x768xf32>
    %cst_8 = arith.constant dense<0.000000e+00> : vector<3xf32>
    %11 = vector.multi_reduction <add>, %10, %cst_8 [1] : vector<3x768xf32> to vector<3xf32>
    %12 = vector.shape_cast %11 : vector<3xf32> to vector<3x1xf32>
    %13 = arith.addf %7, %12 : vector<3x1xf32>
    %c0_9 = arith.constant 0 : index
    %c0_10 = arith.constant 0 : index
    %14 = vector.load %arg4[%c0_9, %c0_10] : memref<3x1xf32, #tpu.memory_space<vmem>>, vector<3x1xf32>
    tpu.vector_store %arg4[%c0_9, %c0_10], %13 {strides = array<i32>} : memref<3x1xf32, #tpu.memory_space<vmem>>, vector<3x1xf32>,
    %c0_i32_11 = arith.constant 0 : i32
    %15 = arith.cmpi eq, %arg0, %c0_i32_11 : i32
    %16 = arith.extui %15 : i1 to i32
    %c0_i32_12 = arith.constant 0 : i32
    %17 = arith.cmpi ne, %16, %c0_i32_12 : i32
    scf.if %17 {
      %c0_13 = arith.constant 0 : index
      %c0_14 = arith.constant 0 : index
      %18 = vector.load %arg4[%c0_13, %c0_14] : memref<3x1xf32, #tpu.memory_space<vmem>>, vector<3x1xf32>
      %cst_15 = arith.constant dense<0xFF800000> : vector<1xf32>
      %19 = vector.multi_reduction <maximumf>, %18, %cst_15 [0] : vector<3x1xf32> to vector<1xf32>
      %20 = vector.shape_cast %19 : vector<1xf32> to vector<1x1xf32>
      %21 = vector.broadcast %20 : vector<1x1xf32> to vector<3x1xf32>
      %22 = arith.subf %18, %21 : vector<3x1xf32>
      %23 = math.exp %22 : vector<3x1xf32>
      %cst_16 = arith.constant dense<0.000000e+00> : vector<1xf32>
      %24 = vector.multi_reduction <add>, %23, %cst_16 [0] : vector<3x1xf32> to vector<1xf32>
      %25 = vector.shape_cast %24 : vector<1xf32> to vector<1x1xf32>
      %26 = vector.broadcast %25 : vector<1x1xf32> to vector<3x1xf32>
      %27 = arith.divf %23, %26 : vector<3x1xf32>
      %c0_17 = arith.constant 0 : index
      %c0_18 = arith.constant 0 : index
      %28 = vector.load %arg4[%c0_17, %c0_18] : memref<3x1xf32, #tpu.memory_space<vmem>>, vector<3x1xf32>
      tpu.vector_store %arg4[%c0_17, %c0_18], %27 {strides = array<i32>} : memref<3x1xf32, #tpu.memory_space<vmem>>, vector<3x1xf32>,
    } else {
    }
    return
  }
  func.func @transform_0(%arg0: i32) -> (i32, i32) {
    %c0_i32 = arith.constant 0 : i32
    %c0_i32_0 = arith.constant 0 : i32
    %c0_i32_1 = arith.constant 0 : i32
    return %c0_i32, %c0_i32_0 : i32, i32
  }
  func.func @transform_1(%arg0: i32) -> (i32, i32) {
    %c0_i32 = arith.constant 0 : i32
    %c0_i32_0 = arith.constant 0 : i32
    return %c0_i32, %arg0 : i32, i32
  }
  func.func @transform_2(%arg0: i32) -> (i32, i32) {
    %c0_i32 = arith.constant 0 : i32
    %c0_i32_0 = arith.constant 0 : i32
    return %c0_i32, %arg0 : i32, i32
  }
  func.func @transform_3(%arg0: i32) -> (i32, i32) {
    %c0_i32 = arith.constant 0 : i32
    %c0_i32_0 = arith.constant 0 : i32
    %c0_i32_1 = arith.constant 0 : i32
    return %c0_i32, %c0_i32_0 : i32, i32
  }
}

</mosaic_0001>

<bundles_post_ra>
// kernel: _ent_forward.1
= control target key start
LH: loop header
LB: loop body
LE: loop exit
PB: predicated region body
PF: predicated region fallthrough
CT: control target
= control target key end

     0   :  { %8 = vsyncpa [#allocation3], 0  ;;  %s3207_s0 = inlined_call_operand.hbm [shape: f32[3,768], index: 0, kind: input, shape index: {}]   ;;  %s3208_s1 = inlined_call_operand.hbm [shape: bf16[768,768], index: 1, kind: input, shape index: {}]   ;;  %s3209_s2 = inlined_call_operand.hbm [shape: f32[1,768], index: 2, kind: input, shape index: {}]   ;;  %s3210_s3 = inlined_call_operand.vmem [shape: f32[3,1], index: 3, kind: output, shape index: {}]  }
   0x1   :  { %9 = vsyncpa [#allocation5], 0  ;;  %s3083_s12 = smov [#allocation4]   ;;  %s3013_s16 = scalar_lea.hbm %s3208_s1, 36864 }
   0x2   :  { %s25_s13 = sshll.u32 %s3083_s12, 4  ;;  %p3014_p0 = scmp.ne.s32.totalorder %s3208_s1, %s3013_s16  ;;  %s26_s13 = int_to_ptr.vmem [resolvable:$true] %s25_s13 }
   0x3   :  { %p3017_p1 = scmp.lt.u32.totalorder %s3013_s16, %s3208_s1 }
   0x5   :  { %p3019_p2 = pnand %p3017_p1, %p3014_p0 }
   0x7   :  { %3022 = shalt.err (!%p3019_p2)
}
   0x8   :  { %s3023_s21 = scalar_lea.vmem %s26_s13, 36864  ;;  %p3028_p4 = scmp.lt.s32.totalorder %s26_s13, %s26_s13 }
   0x9   :  { %p3024_p3 = scmp.ne.s32.totalorder %s26_s13, %s3023_s21  ;;  %p3029_p5 = scmp.lt.s32.totalorder %s3023_s21, %s3023_s21 }
   0xb   :  { %p3030_p6 = por %p3029_p5, %p3028_p4 }
   0xd   :  { %p3031_p7 = pnand %p3030_p6, %p3024_p3 }
   0xf   :  { %3034 = shalt.err (!%p3031_p7)
}
  0x10   :  { %s3084_s22 = smov 384   ;;  %s3085_s23 = smov 24  }
  0x11   :  { %31 = dma.hbm_to_vmem [thread:$0]  %s3208_s1, 36864, %s26_s13, [#allocation5], %s3084_s22, %s3084_s22, %s3085_s23  }
  0x12   :  { %s3086_s26 = smov [#allocation2]   ;;  %s3087_s28 = smov [#allocation6]  }
  0x13   :  { %s16_s27 = sshll.u32 %s3086_s26, 4  ;;  %s38_s29 = sshll.u32 %s3087_s28, 4  ;;  %s17_s27 = int_to_ptr.vmem [resolvable:$true] %s16_s27  ;;  %s39_s29 = int_to_ptr.vmem [resolvable:$true] %s38_s29 }
  0x14   :  { %s3035_s5 = scalar_lea.hbm %s3207_s0, 384 }
  0x15   :  { %p3036_p8 = scmp.ne.s32.totalorder %s3207_s0, %s3035_s5  ;;  %p3039_p9 = scmp.lt.u32.totalorder %s3035_s5, %s3207_s0 }
  0x17   :  { %p3041_p10 = pnand %p3039_p9, %p3036_p8 }
  0x19   :  { %3044 = shalt.err (!%p3041_p10)
}
  0x1a   :  { %s3045_s1 = scalar_lea.vmem %s17_s27, 384  ;;  %p3050_p12 = scmp.lt.s32.totalorder %s17_s27, %s17_s27 }
  0x1b   :  { %p3046_p11 = scmp.ne.s32.totalorder %s17_s27, %s3045_s1  ;;  %p3051_p13 = scmp.lt.s32.totalorder %s3045_s1, %s3045_s1 }
  0x1d   :  { %p3052_p0 = por %p3051_p13, %p3050_p12 }
  0x1f   :  { %p3053_p1 = pnand %p3052_p0, %p3046_p11 }
  0x21   :  { %3056 = shalt.err (!%p3053_p1)
}
  0x22   :  { %19 = dma.hbm_to_vmem [thread:$0]  %s3207_s0, 384, %s17_s27, [#allocation3]  }
  0x23   :  { %s3057_s14 = scalar_lea.hbm %s3209_s2, 96 }
  0x24   :  { %p3058_p2 = scmp.ne.s32.totalorder %s3209_s2, %s3057_s14  ;;  %p3061_p3 = scmp.lt.u32.totalorder %s3057_s14, %s3209_s2 }
  0x26   :  { %p3063_p4 = pnand %p3061_p3, %p3058_p2 }
  0x28   :  { %3066 = shalt.err (!%p3063_p4)
}
  0x29   :  { %s3067_s19 = scalar_lea.vmem %s39_s29, 96  ;;  %p3072_p6 = scmp.lt.s32.totalorder %s39_s29, %s39_s29 }
  0x2a   :  { %p3068_p5 = scmp.ne.s32.totalorder %s39_s29, %s3067_s19  ;;  %p3073_p7 = scmp.lt.s32.totalorder %s3067_s19, %s3067_s19 }
  0x2c   :  { %p3074_p8 = por %p3073_p7, %p3072_p6 }
  0x2e   :  { %p3075_p9 = pnand %p3074_p8, %p3068_p5 }
  0x30   :  { %3078 = shalt.err (!%p3075_p9)
}
  0x31   :  { %41 = dma.hbm_to_vmem [thread:$0]  %s3209_s2, 96, %s39_s29, [#allocation5]  }
  0x32   :  { %3079 = dma.done.wait [#allocation3], 384  }
  0x33   :  { %3080 = vsyncadd [#allocation3], 4294966912 }
  0x34   :  { %3081 = dma.done.wait [#allocation5], 36960  }
  0x35   :  { %3082 = vsyncadd [#allocation5], 4294930336  ;;  %v2574_v0 = vld [vmem:[#allocation4 + $0x4] ss:$24 sps:$4 sm:$0xff]   ;;  %v2578_v2 = vld [vmem:[#allocation4] ss:$24 sps:$4 sm:$0xff]  }
  0x36   :  { %v2576_v1 = vld [vmem:[#allocation4 + $0x304] ss:$24 sps:$4 sm:$0xff]   ;;  %1803 = vmatprep.subr.bf16.mxu1 %v2574_v0  ;;  %v2579_v3 = vld [vmem:[#allocation4 + $0x300] ss:$24 sps:$4 sm:$0xff]   ;;  %v2580_v4 = vld [vmem:[#allocation4 + $0x34] ss:$24 sps:$4 sm:$0xff]  }
  0x37   :  { %1844 = vmatprep.subr.bf16.mxu0 %v2576_v1  ;;  %1804 = vmatpush1.bf16.msra.mxu1 %v2578_v2  ;;  %v2582_v5 = vld [vmem:[#allocation4 + $0x334] ss:$24 sps:$4 sm:$0xff]   ;;  %v2584_v6 = vld [vmem:[#allocation4 + $0x30] ss:$24 sps:$4 sm:$0xff]   ;;  %v2586_v8 = vld [vmem:[#allocation4 + $0x64] ss:$24 sps:$4 sm:$0xff]  }
  0x38   :  { %1845 = vmatpush1.bf16.msra.mxu0 %v2579_v3  ;;  %1805 = vmatprep.subr.bf16.mxu1 %v2580_v4  ;;  %v2585_v7 = vld [vmem:[#allocation4 + $0x330] ss:$24 sps:$4 sm:$0xff]   ;;  %v2588_v9 = vld [vmem:[#allocation4 + $0x364] ss:$24 sps:$4 sm:$0xff]   ;;  %v2590_v10 = vld [vmem:[#allocation4 + $0x60] ss:$24 sps:$4 sm:$0xff]  }
  0x39   :  { %1846 = vmatprep.subr.bf16.mxu0 %v2582_v5  ;;  %v2591_v11 = vld [vmem:[#allocation4 + $0x360] ss:$24 sps:$4 sm:$0xff]   ;;  %v2592_v12 = vld [vmem:[#allocation4 + $0x94] ss:$24 sps:$4 sm:$0xff]   ;;  %v2596_v14 = vld [vmem:[#allocation4 + $0x90] ss:$24 sps:$4 sm:$0xff]  }
  0x3a   :  { %v2594_v13 = vld [vmem:[#allocation4 + $0x394] ss:$24 sps:$4 sm:$0xff]   ;;  %v2597_v15 = vld [vmem:[#allocation4 + $0x390] ss:$24 sps:$4 sm:$0xff]   ;;  %v2598_v16 = vld [vmem:[#allocation4 + $0xc4] ss:$24 sps:$4 sm:$0xff]  }
  0x3b   :  { %1806 = vmatpush1.bf16.msra.mxu1 %v2584_v6  ;;  %v2600_v17 = vld [vmem:[#allocation4 + $0x3c4] ss:$24 sps:$4 sm:$0xff]   ;;  %v2602_v18 = vld [vmem:[#allocation4 + $0xc0] ss:$24 sps:$4 sm:$0xff]   ;;  %v2604_v20 = vld [vmem:[#allocation4 + $0xf4] ss:$24 sps:$4 sm:$0xff]  }
  0x3c   :  { %1847 = vmatpush1.bf16.msra.mxu0 %v2585_v7  ;;  %1807 = vmatprep.subr.bf16.mxu1 %v2586_v8  ;;  %v2603_v19 = vld [vmem:[#allocation4 + $0x3c0] ss:$24 sps:$4 sm:$0xff]   ;;  %v2606_v21 = vld [vmem:[#allocation4 + $0x3f4] ss:$24 sps:$4 sm:$0xff]   ;;  %v2608_v22 = vld [vmem:[#allocation4 + $0xf0] ss:$24 sps:$4 sm:$0xff]  }
  0x3d   :  { %1848 = vmatprep.subr.bf16.mxu0 %v2588_v9  ;;  %v2609_v23 = vld [vmem:[#allocation4 + $0x3f0] ss:$24 sps:$4 sm:$0xff]   ;;  %v2610_v24 = vld [vmem:[#allocation4 + $0x124] ss:$24 sps:$4 sm:$0xff]   ;;  %v2614_v26 = vld [vmem:[#allocation4 + $0x120] ss:$24 sps:$4 sm:$0xff]  }
  0x3e   :  { %v2612_v25 = vld [vmem:[#allocation4 + $0x424] ss:$24 sps:$4 sm:$0xff]   ;;  %v2615_v27 = vld [vmem:[#allocation4 + $0x420] ss:$24 sps:$4 sm:$0xff]   ;;  %v2616_v28 = vld [vmem:[#allocation4 + $0x154] ss:$24 sps:$4 sm:$0xff]  }
  0x3f   :  { %1808 = vmatpush1.bf16.msra.mxu1 %v2590_v10  ;;  %v2618_v29 = vld [vmem:[#allocation4 + $0x454] ss:$24 sps:$4 sm:$0xff]   ;;  %v2620_v30 = vld [vmem:[#allocation4 + $0x150] ss:$24 sps:$4 sm:$0xff]   ;;  %v2622_v32 = vld [vmem:[#allocation4 + $0x184] ss:$24 sps:$4 sm:$0xff]  }
  0x40   :  { %1849 = vmatpush1.bf16.msra.mxu0 %v2591_v11  ;;  %1809 = vmatprep.subr.bf16.mxu1 %v2592_v12  ;;  %v2621_v31 = vld [vmem:[#allocation4 + $0x450] ss:$24 sps:$4 sm:$0xff]   ;;  %v2624_v33 = vld [vmem:[#allocation4 + $0x484] ss:$24 sps:$4 sm:$0xff]   ;;  %v2626_v34 = vld [vmem:[#allocation4 + $0x180] ss:$24 sps:$4 sm:$0xff]  }
  0x41   :  { %1850 = vmatprep.subr.bf16.mxu0 %v2594_v13  ;;  %v2627_v35 = vld [vmem:[#allocation4 + $0x480] ss:$24 sps:$4 sm:$0xff]   ;;  %v2628_v36 = vld [vmem:[#allocation4 + $0x1b4] ss:$24 sps:$4 sm:$0xff]   ;;  %v2632_v38 = vld [vmem:[#allocation4 + $0x1b0] ss:$24 sps:$4 sm:$0xff]  }
  0x42   :  { %v2630_v37 = vld [vmem:[#allocation4 + $0x4b4] ss:$24 sps:$4 sm:$0xff]   ;;  %v2633_v39 = vld [vmem:[#allocation4 + $0x4b0] ss:$24 sps:$4 sm:$0xff]   ;;  %v2634_v40 = vld [vmem:[#allocation4 + $0x1e4] ss:$24 sps:$4 sm:$0xff]  }
  0x43   :  { %1810 = vmatpush1.bf16.msra.mxu1 %v2596_v14  ;;  %v2636_v41 = vld [vmem:[#allocation4 + $0x4e4] ss:$24 sps:$4 sm:$0xff]   ;;  %v2638_v42 = vld [vmem:[#allocation4 + $0x1e0] ss:$24 sps:$4 sm:$0xff]   ;;  %v2640_v44 = vld [vmem:[#allocation4 + $0x214] ss:$24 sps:$4 sm:$0xff]  }
  0x44   :  { %1851 = vmatpush1.bf16.msra.mxu0 %v2597_v15  ;;  %1811 = vmatprep.subr.bf16.mxu1 %v2598_v16  ;;  %v2639_v43 = vld [vmem:[#allocation4 + $0x4e0] ss:$24 sps:$4 sm:$0xff]   ;;  %v2642_v45 = vld [vmem:[#allocation4 + $0x514] ss:$24 sps:$4 sm:$0xff]   ;;  %v2644_v49 = vld [vmem:[#allocation4 + $0x210] ss:$24 sps:$4 sm:$0xff]  }
  0x45   :  { %1852 = vmatprep.subr.bf16.mxu0 %v2600_v17  ;;  %v57_v46 = vld [vmem:[#allocation2] sm:$0x77]  ;;  %v58_v48 = vld [vmem:[#allocation2 + $0x8] sm:$0x77]  ;;  %v2646_v52 = vld [vmem:[#allocation4 + $0x244] ss:$24 sps:$4 sm:$0xff]  }
  0x46   :  { %v63_v47 = vcombine.high %v57_v46, %v57_v46  ;;  %v2645_v50 = vld [vmem:[#allocation4 + $0x510] ss:$24 sps:$4 sm:$0xff]   ;;  %v64_v51 = vcombine.high %v58_v48, %v58_v48  ;;  %v2648_v53 = vld [vmem:[#allocation4 + $0x544] ss:$24 sps:$4 sm:$0xff]   ;;  %v2650_v56 = vld [vmem:[#allocation4 + $0x240] ss:$24 sps:$4 sm:$0xff]   ;;  %v3151_v8 = vpack.c.bf16 %v57_v46, %v57_v46  ;;  %v3153_v9 = vpack.c.bf16 %v58_v48, %v58_v48 }
  0x47   :  { %1812 = vmatpush1.bf16.msra.mxu1 %v2602_v18  ;;  %v2651_v57 = vld [vmem:[#allocation4 + $0x540] ss:$24 sps:$4 sm:$0xff]   ;;  %v2652_v58 = vld [vmem:[#allocation4 + $0x274] ss:$24 sps:$4 sm:$0xff]   ;;  %v2656_v60 = vld [vmem:[#allocation4 + $0x270] ss:$24 sps:$4 sm:$0xff]  }
  0x48   :  { %1853 = vmatpush1.bf16.msra.mxu0 %v2603_v19  ;;  %1813 = vmatprep.subr.bf16.mxu1 %v2604_v20  ;;  %v3145_v54 = vpack.c.bf16 %v63_v47, %v63_v47  ;;  %v3147_v55 = vpack.c.bf16 %v64_v51, %v64_v51  ;;  %v2654_v59 = vld [vmem:[#allocation4 + $0x574] ss:$24 sps:$4 sm:$0xff]   ;;  %v2657_v61 = vld [vmem:[#allocation4 + $0x570] ss:$24 sps:$4 sm:$0xff]   ;;  %v2658_v62 = vld [vmem:[#allocation4 + $0x2a4] ss:$24 sps:$4 sm:$0xff]  }
  0x49   :  { %1854 = vmatprep.subr.bf16.mxu0 %v2606_v21  ;;  %v2660_v63 = vld [vmem:[#allocation4 + $0x5a4] ss:$24 sps:$4 sm:$0xff]   ;;  %v2662_v0 = vld [vmem:[#allocation4 + $0x2a0] ss:$24 sps:$4 sm:$0xff]   ;;  %v2664_v2 = vld [vmem:[#allocation4 + $0x2d4] ss:$24 sps:$4 sm:$0xff]  }
  0x4a   :  { %1835 = vmatprep.mubr.bf16.mxu1 %v3145_v54  ;;  %1876 = vmatprep.mubr.bf16.mxu0 %v3147_v55  ;;  %v2663_v1 = vld [vmem:[#allocation4 + $0x5a0] ss:$24 sps:$4 sm:$0xff]   ;;  %v2666_v3 = vld [vmem:[#allocation4 + $0x5d4] ss:$24 sps:$4 sm:$0xff]   ;;  %v2668_v4 = vld [vmem:[#allocation4 + $0x2d0] ss:$24 sps:$4 sm:$0xff]  }
  0x4b   :  { %1814 = vmatpush1.bf16.msra.mxu1 %v2608_v22  ;;  %v2669_v5 = vld [vmem:[#allocation4 + $0x5d0] ss:$24 sps:$4 sm:$0xff]   ;;  %v2674_v6 = vld [vmem:[#allocation4 + $0x604] ss:$24 sps:$4 sm:$0xff]   ;;  %v2672_v10 = vld [vmem:[#allocation4 + $0x600] ss:$24 sps:$4 sm:$0xff]  }
  0x4c   :  { %1855 = vmatpush1.bf16.msra.mxu0 %v2609_v23  ;;  %1815 = vmatprep.subr.bf16.mxu1 %v2610_v24  ;;  %v2677_v7 = vld [vmem:[#allocation4 + $0xc] ss:$24 sps:$4 sm:$0xff]   ;;  %v2675_v11 = vld [vmem:[#allocation4 + $0x8] ss:$24 sps:$4 sm:$0xff]   ;;  %v2683_v13 = vld [vmem:[#allocation4 + $0x3c] ss:$24 sps:$4 sm:$0xff]  }
  0x4d   :  { %1856 = vmatprep.subr.bf16.mxu0 %v2612_v25  ;;  %v2680_v12 = vld [vmem:[#allocation4 + $0x634] ss:$24 sps:$4 sm:$0xff]   ;;  %v2678_v14 = vld [vmem:[#allocation4 + $0x630] ss:$24 sps:$4 sm:$0xff]   ;;  %v2686_v16 = vld [vmem:[#allocation4 + $0x664] ss:$24 sps:$4 sm:$0xff]  }
  0x4e   :  { %v2681_v15 = vld [vmem:[#allocation4 + $0x38] ss:$24 sps:$4 sm:$0xff]   ;;  %v2689_v17 = vld [vmem:[#allocation4 + $0x6c] ss:$24 sps:$4 sm:$0xff]   ;;  %v2687_v19 = vld [vmem:[#allocation4 + $0x68] ss:$24 sps:$4 sm:$0xff]  }
  0x4f   :  { %1816 = vmatpush1.bf16.msra.mxu1 %v2614_v26  ;;  %v2684_v18 = vld [vmem:[#allocation4 + $0x660] ss:$24 sps:$4 sm:$0xff]   ;;  %v2692_v20 = vld [vmem:[#allocation4 + $0x694] ss:$24 sps:$4 sm:$0xff]   ;;  %v2690_v22 = vld [vmem:[#allocation4 + $0x690] ss:$24 sps:$4 sm:$0xff]  }
  0x50   :  { %1857 = vmatpush1.bf16.msra.mxu0 %v2615_v27  ;;  %1817 = vmatprep.subr.bf16.mxu1 %v2616_v28  ;;  %v2695_v21 = vld [vmem:[#allocation4 + $0x9c] ss:$24 sps:$4 sm:$0xff]   ;;  %v2693_v23 = vld [vmem:[#allocation4 + $0x98] ss:$24 sps:$4 sm:$0xff]   ;;  %v2701_v25 = vld [vmem:[#allocation4 + $0xcc] ss:$24 sps:$4 sm:$0xff]  }
  0x51   :  { %1858 = vmatprep.subr.bf16.mxu0 %v2618_v29  ;;  %v2698_v24 = vld [vmem:[#allocation4 + $0x6c4] ss:$24 sps:$4 sm:$0xff]   ;;  %v2696_v26 = vld [vmem:[#allocation4 + $0x6c0] ss:$24 sps:$4 sm:$0xff]   ;;  %v2704_v28 = vld [vmem:[#allocation4 + $0x6f4] ss:$24 sps:$4 sm:$0xff]  }
  0x52   :  { %v2699_v27 = vld [vmem:[#allocation4 + $0xc8] ss:$24 sps:$4 sm:$0xff]   ;;  %v2707_v29 = vld [vmem:[#allocation4 + $0xfc] ss:$24 sps:$4 sm:$0xff]   ;;  %vm2211_vm0 = vcmask 1042432   ;;  %vm55_vm1 = vcmask 2048  }
  0x53   :  { %1818 = vmatpush1.bf16.msra.mxu1 %v2620_v30  ;;  %v2702_v30 = vld [vmem:[#allocation4 + $0x6f0] ss:$24 sps:$4 sm:$0xff]   ;;  %v2728_v47 = vld [vmem:[#allocation4 + $0x7b4] ss:$24 sps:$4 sm:$0xff]   ;;  %v2734_v51 = vld [vmem:[#allocation4 + $0x7e4] ss:$24 sps:$4 sm:$0xff]  }
  0x54   :  { %1859 = vmatpush1.bf16.msra.mxu0 %v2621_v31  ;;  %1819 = vmatprep.subr.bf16.mxu1 %v2622_v32  ;;  %v2705_v31 = vld [vmem:[#allocation4 + $0xf8] ss:$24 sps:$4 sm:$0xff]   ;;  %v2710_v32 = vld [vmem:[#allocation4 + $0x724] ss:$24 sps:$4 sm:$0xff]   ;;  %v2723_v46 = vld [vmem:[#allocation4 + $0x188] ss:$24 sps:$4 sm:$0xff]  }
  0x55   :  { %1860 = vmatprep.subr.bf16.mxu0 %v2624_v33  ;;  %v2713_v33 = vld [vmem:[#allocation4 + $0x12c] ss:$24 sps:$4 sm:$0xff]   ;;  %v2731_v48 = vld [vmem:[#allocation4 + $0x1bc] ss:$24 sps:$4 sm:$0xff]  }
  0x57   :  { %1820 = vmatpush1.bf16.msra.mxu1 %v2626_v34  ;;  %v3158_v34 = vld [vmem:[#allocation2 + $0x10] sm:$0x77] }
  0x58   :  { %1861 = vmatpush1.bf16.msra.mxu0 %v2627_v35  ;;  %1821 = vmatprep.subr.bf16.mxu1 %v2628_v36  ;;  %v2708_v35 = vld [vmem:[#allocation4 + $0x720] ss:$24 sps:$4 sm:$0xff]   ;;  %v65_v36 = vcombine.high %v3158_v34, %v3158_v34 }
  0x59   :  { %1862 = vmatprep.subr.bf16.mxu0 %v2630_v37  ;;  %v2711_v37 = vld [vmem:[#allocation4 + $0x128] ss:$24 sps:$4 sm:$0xff]  }
  0x5b   :  { %1822 = vmatpush1.bf16.msra.mxu1 %v2632_v38  ;;  %v2716_v38 = vld [vmem:[#allocation4 + $0x754] ss:$24 sps:$4 sm:$0xff]  }
  0x5c   :  { %1863 = vmatpush1.bf16.msra.mxu0 %v2633_v39  ;;  %1823 = vmatprep.subr.bf16.mxu1 %v2634_v40  ;;  %v2719_v39 = vld [vmem:[#allocation4 + $0x15c] ss:$24 sps:$4 sm:$0xff]   ;;  %v3162_v40 = vpack.c.bf16 %v65_v36, %v65_v36 }
  0x5d   :  { %1864 = vmatprep.subr.bf16.mxu0 %v2636_v41  ;;  %v2714_v41 = vld [vmem:[#allocation4 + $0x750] ss:$24 sps:$4 sm:$0xff]   ;;  %v2804_v36 = vld [vmem:[#allocation4 + $0x104] ss:$24 sps:$4 sm:$0xff]  }
  0x5f   :  { %1824 = vmatpush1.bf16.msra.mxu1 %v2638_v42  ;;  %v2717_v42 = vld [vmem:[#allocation4 + $0x158] ss:$24 sps:$4 sm:$0xff]  }
  0x60   :  { %1865 = vmatpush1.bf16.msra.mxu0 %v2639_v43  ;;  %1825 = vmatprep.subr.bf16.mxu1 %v2640_v44  ;;  %v2722_v43 = vld [vmem:[#allocation4 + $0x784] ss:$24 sps:$4 sm:$0xff]  }
  0x61   :  { %1866 = vmatprep.subr.bf16.mxu0 %v2642_v45  ;;  %v2725_v44 = vld [vmem:[#allocation4 + $0x18c] ss:$24 sps:$4 sm:$0xff]   ;;  %v2720_v45 = vld [vmem:[#allocation4 + $0x780] ss:$24 sps:$4 sm:$0xff]  }
  0x63   :  { %1826 = vmatpush1.bf16.msra.mxu1 %v2644_v49  ;;  %v2726_v49 = vld [vmem:[#allocation4 + $0x7b0] ss:$24 sps:$4 sm:$0xff]  }
  0x64   :  { %1867 = vmatpush1.bf16.msra.mxu0 %v2645_v50  ;;  %1827 = vmatprep.subr.bf16.mxu1 %v2646_v52  ;;  %v2729_v50 = vld [vmem:[#allocation4 + $0x1b8] ss:$24 sps:$4 sm:$0xff]   ;;  %v2737_v52 = vld [vmem:[#allocation4 + $0x1ec] ss:$24 sps:$4 sm:$0xff]  }
  0x65   :  { %1868 = vmatprep.subr.bf16.mxu0 %v2648_v53  ;;  %v2732_v53 = vld [vmem:[#allocation4 + $0x7e0] ss:$24 sps:$4 sm:$0xff]  }
  0x67   :  { %1828 = vmatpush1.bf16.msra.mxu1 %v2650_v56  ;;  %v2735_v56 = vld [vmem:[#allocation4 + $0x1e8] ss:$24 sps:$4 sm:$0xff]  }
  0x68   :  { %1869 = vmatpush1.bf16.msra.mxu0 %v2651_v57  ;;  %1829 = vmatprep.subr.bf16.mxu1 %v2652_v58  ;;  %v2740_v57 = vld [vmem:[#allocation4 + $0x814] ss:$24 sps:$4 sm:$0xff]  }
  0x69   :  { %1870 = vmatprep.subr.bf16.mxu0 %v2654_v59  ;;  %v2743_v58 = vld [vmem:[#allocation4 + $0x21c] ss:$24 sps:$4 sm:$0xff]   ;;  %v2738_v59 = vld [vmem:[#allocation4 + $0x810] ss:$24 sps:$4 sm:$0xff]  }
  0x6b   :  { %1830 = vmatpush1.bf16.msra.mxu1 %v2656_v60  ;;  %v2741_v60 = vld [vmem:[#allocation4 + $0x218] ss:$24 sps:$4 sm:$0xff]  }
  0x6c   :  { %1871 = vmatpush1.bf16.msra.mxu0 %v2657_v61  ;;  %1831 = vmatprep.subr.bf16.mxu1 %v2658_v62  ;;  %v2746_v61 = vld [vmem:[#allocation4 + $0x844] ss:$24 sps:$4 sm:$0xff]  }
  0x6d   :  { %1872 = vmatprep.subr.bf16.mxu0 %v2660_v63  ;;  %v2749_v62 = vld [vmem:[#allocation4 + $0x24c] ss:$24 sps:$4 sm:$0xff]   ;;  %v2744_v63 = vld [vmem:[#allocation4 + $0x840] ss:$24 sps:$4 sm:$0xff]  }
  0x6f   :  { %1832 = vmatpush1.bf16.msra.mxu1 %v2662_v0  ;;  %v2747_v0 = vld [vmem:[#allocation4 + $0x248] ss:$24 sps:$4 sm:$0xff]  }
  0x70   :  { %1873 = vmatpush1.bf16.msra.mxu0 %v2663_v1  ;;  %1833 = vmatprep.subr.bf16.mxu1 %v2664_v2  ;;  %v2752_v1 = vld [vmem:[#allocation4 + $0x874] ss:$24 sps:$4 sm:$0xff]  }
  0x71   :  { %1874 = vmatprep.subr.bf16.mxu0 %v2666_v3  ;;  %v2755_v2 = vld [vmem:[#allocation4 + $0x27c] ss:$24 sps:$4 sm:$0xff]   ;;  %v2750_v3 = vld [vmem:[#allocation4 + $0x870] ss:$24 sps:$4 sm:$0xff]  }
  0x73   :  { %1834 = vmatpush1.bf16.msra.mxu1 %v2668_v4  ;;  %v2753_v4 = vld [vmem:[#allocation4 + $0x278] ss:$24 sps:$4 sm:$0xff]  }
  0x74   :  { %1875 = vmatpush1.bf16.msra.mxu0 %v2669_v5  ;;  %1926 = vmatprep.subr.bf16.mxu1 %v2677_v7  ;;  %v2758_v5 = vld [vmem:[#allocation4 + $0x8a4] ss:$24 sps:$4 sm:$0xff]   ;;  %v2756_v7 = vld [vmem:[#allocation4 + $0x8a0] ss:$24 sps:$4 sm:$0xff]  }
  0x75   :  { %1885 = vmatprep.subr.bf16.mxu0 %v2674_v6  ;;  %v2761_v6 = vld [vmem:[#allocation4 + $0x2ac] ss:$24 sps:$4 sm:$0xff]  }
  0x76   :  { %1836 = vmatmul.mubr.bf16.vlgmr.msra.gmra.mrb[0].mxu1 %v3151_v8 }
  0x77   :  { %1877 = vmatmul.mubr.bf16.vlgmr.msra.gmra.mrb[0].mxu0 %v3153_v9  ;;  %1927 = vmatpush1.bf16.msra.mxu1 %v2675_v11  ;;  %v2764_v11 = vld [vmem:[#allocation4 + $0x8d4] ss:$24 sps:$4 sm:$0xff]  }
  0x78   :  { %1886 = vmatpush1.bf16.msra.mxu0 %v2672_v10  ;;  %1928 = vmatprep.subr.bf16.mxu1 %v2683_v13  ;;  %v2759_v10 = vld [vmem:[#allocation4 + $0x2a8] ss:$24 sps:$4 sm:$0xff]  }
  0x79   :  { %1887 = vmatprep.subr.bf16.mxu0 %v2680_v12  ;;  %1958 = vmatprep.mubr.bf16.mxu1 %v3145_v54  ;;  %v2767_v12 = vld [vmem:[#allocation4 + $0x2dc] ss:$24 sps:$4 sm:$0xff]   ;;  %v2762_v13 = vld [vmem:[#allocation4 + $0x8d0] ss:$24 sps:$4 sm:$0xff]  }
  0x7a   :  { %1917 = vmatprep.mubr.bf16.mxu0 %v3162_v40 }
  0x7b   :  { %1929 = vmatpush1.bf16.msra.mxu1 %v2681_v15  ;;  %v2771_v15 = vld [vmem:[#allocation4 + $0x30c] ss:$24 sps:$4 sm:$0xff]  }
  0x7c   :  { %1888 = vmatpush1.bf16.msra.mxu0 %v2678_v14  ;;  %1930 = vmatprep.subr.bf16.mxu1 %v2689_v17  ;;  %v2765_v14 = vld [vmem:[#allocation4 + $0x2d8] ss:$24 sps:$4 sm:$0xff]   ;;  %v3167_v17 = vpack.c.bf16 %v3158_v34, %v3158_v34  ;;  %v2793_v34 = vld [vmem:[#allocation4 + $0x3c8] ss:$24 sps:$4 sm:$0xff]  }
  0x7d   :  { %1889 = vmatprep.subr.bf16.mxu0 %v2686_v16  ;;  %v2774_v16 = vld [vmem:[#allocation4 + $0x14] ss:$24 sps:$4 sm:$0xff]  }
  0x7f   :  { %1931 = vmatpush1.bf16.msra.mxu1 %v2687_v19  ;;  %v2772_v19 = vld [vmem:[#allocation4 + $0x10] ss:$24 sps:$4 sm:$0xff]  }
  0x80   :  { %1890 = vmatpush1.bf16.msra.mxu0 %v2684_v18  ;;  %1932 = vmatprep.subr.bf16.mxu1 %v2695_v21  ;;  %v2769_v18 = vld [vmem:[#allocation4 + $0x308] ss:$24 sps:$4 sm:$0xff]   ;;  %v2780_v21 = vld [vmem:[#allocation4 + $0x44] ss:$24 sps:$4 sm:$0xff]  }
  0x81   :  { %1891 = vmatprep.subr.bf16.mxu0 %v2692_v20  ;;  %v2777_v20 = vld [vmem:[#allocation4 + $0x33c] ss:$24 sps:$4 sm:$0xff]  }
  0x83   :  { %1933 = vmatpush1.bf16.msra.mxu1 %v2693_v23  ;;  %v2778_v23 = vld [vmem:[#allocation4 + $0x40] ss:$24 sps:$4 sm:$0xff]  }
  0x84   :  { %1892 = vmatpush1.bf16.msra.mxu0 %v2690_v22  ;;  %1934 = vmatprep.subr.bf16.mxu1 %v2701_v25  ;;  %v2775_v22 = vld [vmem:[#allocation4 + $0x338] ss:$24 sps:$4 sm:$0xff]   ;;  %v2786_v25 = vld [vmem:[#allocation4 + $0x74] ss:$24 sps:$4 sm:$0xff]  }
  0x85   :  { %1893 = vmatprep.subr.bf16.mxu0 %v2698_v24  ;;  %v2783_v24 = vld [vmem:[#allocation4 + $0x36c] ss:$24 sps:$4 sm:$0xff]  }
  0x87   :  { %1935 = vmatpush1.bf16.msra.mxu1 %v2699_v27  ;;  %v2784_v27 = vld [vmem:[#allocation4 + $0x70] ss:$24 sps:$4 sm:$0xff]  }
  0x88   :  { %1894 = vmatpush1.bf16.msra.mxu0 %v2696_v26  ;;  %1936 = vmatprep.subr.bf16.mxu1 %v2707_v29  ;;  %v2781_v26 = vld [vmem:[#allocation4 + $0x368] ss:$24 sps:$4 sm:$0xff]   ;;  %v2792_v29 = vld [vmem:[#allocation4 + $0xa4] ss:$24 sps:$4 sm:$0xff]  }
  0x89   :  { %1895 = vmatprep.subr.bf16.mxu0 %v2704_v28  ;;  %v2789_v28 = vld [vmem:[#allocation4 + $0x39c] ss:$24 sps:$4 sm:$0xff]  }
  0x8b   :  { %1937 = vmatpush1.bf16.msra.mxu1 %v2705_v31  ;;  %v2790_v31 = vld [vmem:[#allocation4 + $0xa0] ss:$24 sps:$4 sm:$0xff]  }
  0x8c   :  { %1896 = vmatpush1.bf16.msra.mxu0 %v2702_v30  ;;  %1938 = vmatprep.subr.bf16.mxu1 %v2713_v33  ;;  %v2787_v30 = vld [vmem:[#allocation4 + $0x398] ss:$24 sps:$4 sm:$0xff]   ;;  %v2798_v33 = vld [vmem:[#allocation4 + $0xd4] ss:$24 sps:$4 sm:$0xff]  }
  0x8d   :  { %1897 = vmatprep.subr.bf16.mxu0 %v2710_v32  ;;  %v2795_v32 = vld [vmem:[#allocation4 + $0x3cc] ss:$24 sps:$4 sm:$0xff]  }
  0x8f   :  { %1939 = vmatpush1.bf16.msra.mxu1 %v2711_v37  ;;  %v2799_v37 = vld [vmem:[#allocation4 + $0x3f8] ss:$24 sps:$4 sm:$0xff]  }
  0x90   :  { %1898 = vmatpush1.bf16.msra.mxu0 %v2708_v35  ;;  %1940 = vmatprep.subr.bf16.mxu1 %v2719_v39  ;;  %v2801_v35 = vld [vmem:[#allocation4 + $0x3fc] ss:$24 sps:$4 sm:$0xff]   ;;  %v2807_v39 = vld [vmem:[#allocation4 + $0x42c] ss:$24 sps:$4 sm:$0xff]  }
  0x91   :  { %1899 = vmatprep.subr.bf16.mxu0 %v2716_v38  ;;  %v2802_v38 = vld [vmem:[#allocation4 + $0x100] ss:$24 sps:$4 sm:$0xff]  }
  0x93   :  { %1941 = vmatpush1.bf16.msra.mxu1 %v2717_v42  ;;  %v2805_v42 = vld [vmem:[#allocation4 + $0x428] ss:$24 sps:$4 sm:$0xff]  }
  0x94   :  { %1900 = vmatpush1.bf16.msra.mxu0 %v2714_v41  ;;  %1942 = vmatprep.subr.bf16.mxu1 %v2725_v44  ;;  %v2810_v41 = vld [vmem:[#allocation4 + $0x134] ss:$24 sps:$4 sm:$0xff]  }
  0x95   :  { %1901 = vmatprep.subr.bf16.mxu0 %v2722_v43  ;;  %v2808_v43 = vld [vmem:[#allocation4 + $0x130] ss:$24 sps:$4 sm:$0xff]   ;;  %v2813_v44 = vld [vmem:[#allocation4 + $0x45c] ss:$24 sps:$4 sm:$0xff]  }
  0x97   :  { %1943 = vmatpush1.bf16.msra.mxu1 %v2723_v46  ;;  %v2811_v46 = vld [vmem:[#allocation4 + $0x458] ss:$24 sps:$4 sm:$0xff]  }
  0x98   :  { %1902 = vmatpush1.bf16.msra.mxu0 %v2720_v45  ;;  %1944 = vmatprep.subr.bf16.mxu1 %v2731_v48  ;;  %v2816_v45 = vld [vmem:[#allocation4 + $0x164] ss:$24 sps:$4 sm:$0xff]  }
  0x99   :  { %1903 = vmatprep.subr.bf16.mxu0 %v2728_v47  ;;  %v2814_v47 = vld [vmem:[#allocation4 + $0x160] ss:$24 sps:$4 sm:$0xff]   ;;  %v2819_v48 = vld [vmem:[#allocation4 + $0x48c] ss:$24 sps:$4 sm:$0xff]  }
  0x9b   :  { %1945 = vmatpush1.bf16.msra.mxu1 %v2729_v50  ;;  %v2817_v50 = vld [vmem:[#allocation4 + $0x488] ss:$24 sps:$4 sm:$0xff]  }
  0x9c   :  { %1904 = vmatpush1.bf16.msra.mxu0 %v2726_v49  ;;  %1946 = vmatprep.subr.bf16.mxu1 %v2737_v52  ;;  %v2822_v49 = vld [vmem:[#allocation4 + $0x194] ss:$24 sps:$4 sm:$0xff]  }
  0x9d   :  { %1905 = vmatprep.subr.bf16.mxu0 %v2734_v51  ;;  %v2820_v51 = vld [vmem:[#allocation4 + $0x190] ss:$24 sps:$4 sm:$0xff]   ;;  %v2825_v52 = vld [vmem:[#allocation4 + $0x4bc] ss:$24 sps:$4 sm:$0xff]  }
  0x9f   :  { %1947 = vmatpush1.bf16.msra.mxu1 %v2735_v56  ;;  %v2823_v56 = vld [vmem:[#allocation4 + $0x4b8] ss:$24 sps:$4 sm:$0xff]  }
  0xa0   :  { %1906 = vmatpush1.bf16.msra.mxu0 %v2732_v53  ;;  %1948 = vmatprep.subr.bf16.mxu1 %v2743_v58  ;;  %v2828_v53 = vld [vmem:[#allocation4 + $0x1c4] ss:$24 sps:$4 sm:$0xff]  }
  0xa1   :  { %1907 = vmatprep.subr.bf16.mxu0 %v2740_v57  ;;  %v2826_v57 = vld [vmem:[#allocation4 + $0x1c0] ss:$24 sps:$4 sm:$0xff]   ;;  %v2831_v58 = vld [vmem:[#allocation4 + $0x4ec] ss:$24 sps:$4 sm:$0xff]  }
  0xa3   :  { %1949 = vmatpush1.bf16.msra.mxu1 %v2741_v60  ;;  %v2829_v60 = vld [vmem:[#allocation4 + $0x4e8] ss:$24 sps:$4 sm:$0xff]  }
  0xa4   :  { %1908 = vmatpush1.bf16.msra.mxu0 %v2738_v59  ;;  %1950 = vmatprep.subr.bf16.mxu1 %v2749_v62  ;;  %v2834_v59 = vld [vmem:[#allocation4 + $0x1f4] ss:$24 sps:$4 sm:$0xff]  }
  0xa5   :  { %1909 = vmatprep.subr.bf16.mxu0 %v2746_v61  ;;  %v2832_v61 = vld [vmem:[#allocation4 + $0x1f0] ss:$24 sps:$4 sm:$0xff]   ;;  %v2837_v62 = vld [vmem:[#allocation4 + $0x51c] ss:$24 sps:$4 sm:$0xff]  }
  0xa7   :  { %1951 = vmatpush1.bf16.msra.mxu1 %v2747_v0  ;;  %v2835_v0 = vld [vmem:[#allocation4 + $0x518] ss:$24 sps:$4 sm:$0xff]  }
  0xa8   :  { %1910 = vmatpush1.bf16.msra.mxu0 %v2744_v63  ;;  %1952 = vmatprep.subr.bf16.mxu1 %v2755_v2  ;;  %v2840_v63 = vld [vmem:[#allocation4 + $0x224] ss:$24 sps:$4 sm:$0xff]  }
  0xa9   :  { %1911 = vmatprep.subr.bf16.mxu0 %v2752_v1  ;;  %v2838_v1 = vld [vmem:[#allocation4 + $0x220] ss:$24 sps:$4 sm:$0xff]   ;;  %v2843_v2 = vld [vmem:[#allocation4 + $0x54c] ss:$24 sps:$4 sm:$0xff]  }
  0xab   :  { %1953 = vmatpush1.bf16.msra.mxu1 %v2753_v4  ;;  %v2841_v4 = vld [vmem:[#allocation4 + $0x548] ss:$24 sps:$4 sm:$0xff]  }
  0xac   :  { %1912 = vmatpush1.bf16.msra.mxu0 %v2750_v3  ;;  %1954 = vmatprep.subr.bf16.mxu1 %v2761_v6  ;;  %v2846_v3 = vld [vmem:[#allocation4 + $0x254] ss:$24 sps:$4 sm:$0xff]  }
  0xad   :  { %1913 = vmatprep.subr.bf16.mxu0 %v2758_v5  ;;  %v2844_v5 = vld [vmem:[#allocation4 + $0x250] ss:$24 sps:$4 sm:$0xff]   ;;  %v2849_v6 = vld [vmem:[#allocation4 + $0x57c] ss:$24 sps:$4 sm:$0xff]  }
  0xaf   :  { %1955 = vmatpush1.bf16.msra.mxu1 %v2759_v10  ;;  %v2847_v10 = vld [vmem:[#allocation4 + $0x578] ss:$24 sps:$4 sm:$0xff]  }
  0xb0   :  { %1914 = vmatpush1.bf16.msra.mxu0 %v2756_v7  ;;  %1956 = vmatprep.subr.bf16.mxu1 %v2767_v12  ;;  %v2852_v7 = vld [vmem:[#allocation4 + $0x284] ss:$24 sps:$4 sm:$0xff]  }
  0xb1   :  { %1915 = vmatprep.subr.bf16.mxu0 %v2764_v11  ;;  %v2850_v11 = vld [vmem:[#allocation4 + $0x280] ss:$24 sps:$4 sm:$0xff]   ;;  %v2855_v12 = vld [vmem:[#allocation4 + $0x5ac] ss:$24 sps:$4 sm:$0xff]  }
  0xb3   :  { %1957 = vmatpush1.bf16.msra.mxu1 %v2765_v14  ;;  %v2853_v14 = vld [vmem:[#allocation4 + $0x5a8] ss:$24 sps:$4 sm:$0xff]  }
  0xb4   :  { %1916 = vmatpush1.bf16.msra.mxu0 %v2762_v13  ;;  %1967 = vmatprep.subr.bf16.mxu1 %v2771_v15  ;;  %v2858_v13 = vld [vmem:[#allocation4 + $0x2b4] ss:$24 sps:$4 sm:$0xff]   ;;  %v2856_v15 = vld [vmem:[#allocation4 + $0x2b0] ss:$24 sps:$4 sm:$0xff]  }
  0xb5   :  { %2049 = vmatprep.subr.bf16.mxu0 %v2774_v16  ;;  %v2861_v16 = vld [vmem:[#allocation4 + $0x5dc] ss:$24 sps:$4 sm:$0xff]  }
  0xb6   :  { %1959 = vmatmul.mubr.bf16.vlgmr.msra.gmra.mrb[4].mxu1 %v3151_v8 }
  0xb7   :  { %1918 = vmatmul.mubr.bf16.vlgmr.msra.gmra.mrb[0].mxu0 %v3167_v17  ;;  %1968 = vmatpush1.bf16.msra.mxu1 %v2769_v18  ;;  %v2864_v18 = vld [vmem:[#allocation4 + $0x2e4] ss:$24 sps:$4 sm:$0xff]  }
  0xb8   :  { %2050 = vmatpush1.bf16.msra.mxu0 %v2772_v19  ;;  %1969 = vmatprep.subr.bf16.mxu1 %v2777_v20  ;;  %v2859_v19 = vld [vmem:[#allocation4 + $0x5d8] ss:$24 sps:$4 sm:$0xff]  }
  0xb9   :  { %2051 = vmatprep.subr.bf16.mxu0 %v2780_v21  ;;  %1999 = vmatprep.mubr.bf16.mxu1 %v3147_v55  ;;  %v2862_v20 = vld [vmem:[#allocation4 + $0x2e0] ss:$24 sps:$4 sm:$0xff]   ;;  %v2867_v21 = vld [vmem:[#allocation4 + $0x60c] ss:$24 sps:$4 sm:$0xff]  }
  0xba   :  { %2081 = vmatprep.mubr.bf16.mxu0 %v3145_v54  ;;  %v2796_v54 = vld [vmem:[#allocation4 + $0xd0] ss:$24 sps:$4 sm:$0xff]  }
  0xbb   :  { %1970 = vmatpush1.bf16.msra.mxu1 %v2775_v22  ;;  %v2870_v22 = vld [vmem:[#allocation4 + $0x314] ss:$24 sps:$4 sm:$0xff]  }
  0xbc   :  { %2052 = vmatpush1.bf16.msra.mxu0 %v2778_v23  ;;  %1971 = vmatprep.subr.bf16.mxu1 %v2783_v24  ;;  %v2865_v23 = vld [vmem:[#allocation4 + $0x608] ss:$24 sps:$4 sm:$0xff]  }
  0xbd   :  { %2053 = vmatprep.subr.bf16.mxu0 %v2786_v25  ;;  %v2868_v24 = vld [vmem:[#allocation4 + $0x310] ss:$24 sps:$4 sm:$0xff]   ;;  %v2873_v25 = vld [vmem:[#allocation4 + $0x63c] ss:$24 sps:$4 sm:$0xff]  }
  0xbf   :  { %1972 = vmatpush1.bf16.msra.mxu1 %v2781_v26  ;;  %v2876_v26 = vld [vmem:[#allocation4 + $0x344] ss:$24 sps:$4 sm:$0xff]  }
  0xc0   :  { %2054 = vmatpush1.bf16.msra.mxu0 %v2784_v27  ;;  %1973 = vmatprep.subr.bf16.mxu1 %v2789_v28  ;;  %v2871_v27 = vld [vmem:[#allocation4 + $0x638] ss:$24 sps:$4 sm:$0xff]  }
  0xc1   :  { %2055 = vmatprep.subr.bf16.mxu0 %v2792_v29  ;;  %v2874_v28 = vld [vmem:[#allocation4 + $0x340] ss:$24 sps:$4 sm:$0xff]   ;;  %v2879_v29 = vld [vmem:[#allocation4 + $0x66c] ss:$24 sps:$4 sm:$0xff]  }
  0xc3   :  { %1974 = vmatpush1.bf16.msra.mxu1 %v2787_v30  ;;  %v2882_v30 = vld [vmem:[#allocation4 + $0x374] ss:$24 sps:$4 sm:$0xff]  }
  0xc4   :  { %2056 = vmatpush1.bf16.msra.mxu0 %v2790_v31  ;;  %1975 = vmatprep.subr.bf16.mxu1 %v2795_v32  ;;  %v2877_v31 = vld [vmem:[#allocation4 + $0x668] ss:$24 sps:$4 sm:$0xff]  }
  0xc5   :  { %2057 = vmatprep.subr.bf16.mxu0 %v2798_v33  ;;  %v2880_v32 = vld [vmem:[#allocation4 + $0x370] ss:$24 sps:$4 sm:$0xff]   ;;  %v2885_v33 = vld [vmem:[#allocation4 + $0x69c] ss:$24 sps:$4 sm:$0xff]  }
  0xc7   :  { %1976 = vmatpush1.bf16.msra.mxu1 %v2793_v34  ;;  %v2883_v34 = vld [vmem:[#allocation4 + $0x698] ss:$24 sps:$4 sm:$0xff]  }
  0xc8   :  { %2058 = vmatpush1.bf16.msra.mxu0 %v2796_v54  ;;  %1977 = vmatprep.subr.bf16.mxu1 %v2801_v35  ;;  %v2886_v54 = vld [vmem:[#allocation4 + $0x3a0] ss:$24 sps:$4 sm:$0xff]   ;;  %v2891_v35 = vld [vmem:[#allocation4 + $0x6cc] ss:$24 sps:$4 sm:$0xff]  }
  0xc9   :  { %2059 = vmatprep.subr.bf16.mxu0 %v2804_v36  ;;  %v2894_v36 = vld [vmem:[#allocation4 + $0x3d4] ss:$24 sps:$4 sm:$0xff]  }
  0xcb   :  { %1978 = vmatpush1.bf16.msra.mxu1 %v2799_v37  ;;  %v2889_v37 = vld [vmem:[#allocation4 + $0x6c8] ss:$24 sps:$4 sm:$0xff]  }
  0xcc   :  { %2060 = vmatpush1.bf16.msra.mxu0 %v2802_v38  ;;  %1979 = vmatprep.subr.bf16.mxu1 %v2807_v39  ;;  %v2897_v38 = vld [vmem:[#allocation4 + $0x6fc] ss:$24 sps:$4 sm:$0xff]  }
  0xcd   :  { %2061 = vmatprep.subr.bf16.mxu0 %v2810_v41  ;;  %v2900_v39 = vld [vmem:[#allocation4 + $0x404] ss:$24 sps:$4 sm:$0xff]   ;;  %v2895_v41 = vld [vmem:[#allocation4 + $0x6f8] ss:$24 sps:$4 sm:$0xff]  }
  0xcf   :  { %1980 = vmatpush1.bf16.msra.mxu1 %v2805_v42  ;;  %v2898_v42 = vld [vmem:[#allocation4 + $0x400] ss:$24 sps:$4 sm:$0xff]  }
  0xd0   :  { %2062 = vmatpush1.bf16.msra.mxu0 %v2808_v43  ;;  %1981 = vmatprep.subr.bf16.mxu1 %v2813_v44  ;;  %v2903_v43 = vld [vmem:[#allocation4 + $0x72c] ss:$24 sps:$4 sm:$0xff]  }
  0xd1   :  { %2063 = vmatprep.subr.bf16.mxu0 %v2816_v45  ;;  %v2906_v44 = vld [vmem:[#allocation4 + $0x434] ss:$24 sps:$4 sm:$0xff]   ;;  %v2901_v45 = vld [vmem:[#allocation4 + $0x728] ss:$24 sps:$4 sm:$0xff]  }
  0xd3   :  { %1982 = vmatpush1.bf16.msra.mxu1 %v2811_v46  ;;  %v2904_v46 = vld [vmem:[#allocation4 + $0x430] ss:$24 sps:$4 sm:$0xff]  }
  0xd4   :  { %2064 = vmatpush1.bf16.msra.mxu0 %v2814_v47  ;;  %1983 = vmatprep.subr.bf16.mxu1 %v2819_v48  ;;  %v2909_v47 = vld [vmem:[#allocation4 + $0x75c] ss:$24 sps:$4 sm:$0xff]  }
  0xd5   :  { %2065 = vmatprep.subr.bf16.mxu0 %v2822_v49  ;;  %v2912_v48 = vld [vmem:[#allocation4 + $0x464] ss:$24 sps:$4 sm:$0xff]   ;;  %v2907_v49 = vld [vmem:[#allocation4 + $0x758] ss:$24 sps:$4 sm:$0xff]  }
  0xd7   :  { %1984 = vmatpush1.bf16.msra.mxu1 %v2817_v50  ;;  %v2910_v50 = vld [vmem:[#allocation4 + $0x460] ss:$24 sps:$4 sm:$0xff]  }
  0xd8   :  { %2066 = vmatpush1.bf16.msra.mxu0 %v2820_v51  ;;  %1985 = vmatprep.subr.bf16.mxu1 %v2825_v52  ;;  %v2915_v51 = vld [vmem:[#allocation4 + $0x78c] ss:$24 sps:$4 sm:$0xff]  }
  0xd9   :  { %2067 = vmatprep.subr.bf16.mxu0 %v2828_v53  ;;  %v2918_v52 = vld [vmem:[#allocation4 + $0x494] ss:$24 sps:$4 sm:$0xff]   ;;  %v2913_v53 = vld [vmem:[#allocation4 + $0x788] ss:$24 sps:$4 sm:$0xff]  }
  0xdb   :  { %1986 = vmatpush1.bf16.msra.mxu1 %v2823_v56  ;;  %v2916_v56 = vld [vmem:[#allocation4 + $0x490] ss:$24 sps:$4 sm:$0xff]  }
  0xdc   :  { %2068 = vmatpush1.bf16.msra.mxu0 %v2826_v57  ;;  %1987 = vmatprep.subr.bf16.mxu1 %v2831_v58  ;;  %v2921_v57 = vld [vmem:[#allocation4 + $0x7bc] ss:$24 sps:$4 sm:$0xff]  }
  0xdd   :  { %2069 = vmatprep.subr.bf16.mxu0 %v2834_v59  ;;  %v2924_v58 = vld [vmem:[#allocation4 + $0x4c4] ss:$24 sps:$4 sm:$0xff]   ;;  %v2919_v59 = vld [vmem:[#allocation4 + $0x7b8] ss:$24 sps:$4 sm:$0xff]  }
  0xdf   :  { %1988 = vmatpush1.bf16.msra.mxu1 %v2829_v60  ;;  %v2922_v60 = vld [vmem:[#allocation4 + $0x4c0] ss:$24 sps:$4 sm:$0xff]  }
  0xe0   :  { %2070 = vmatpush1.bf16.msra.mxu0 %v2832_v61  ;;  %1989 = vmatprep.subr.bf16.mxu1 %v2837_v62  ;;  %v2927_v61 = vld [vmem:[#allocation4 + $0x7ec] ss:$24 sps:$4 sm:$0xff]  }
  0xe1   :  { %2071 = vmatprep.subr.bf16.mxu0 %v2840_v63  ;;  %v2930_v62 = vld [vmem:[#allocation4 + $0x4f4] ss:$24 sps:$4 sm:$0xff]   ;;  %v2925_v63 = vld [vmem:[#allocation4 + $0x7e8] ss:$24 sps:$4 sm:$0xff]  }
  0xe3   :  { %1990 = vmatpush1.bf16.msra.mxu1 %v2835_v0  ;;  %v2928_v0 = vld [vmem:[#allocation4 + $0x4f0] ss:$24 sps:$4 sm:$0xff]  }
  0xe4   :  { %2072 = vmatpush1.bf16.msra.mxu0 %v2838_v1  ;;  %1991 = vmatprep.subr.bf16.mxu1 %v2843_v2  ;;  %v2933_v1 = vld [vmem:[#allocation4 + $0x81c] ss:$24 sps:$4 sm:$0xff]  }
  0xe5   :  { %2073 = vmatprep.subr.bf16.mxu0 %v2846_v3  ;;  %v2936_v2 = vld [vmem:[#allocation4 + $0x524] ss:$24 sps:$4 sm:$0xff]   ;;  %v2931_v3 = vld [vmem:[#allocation4 + $0x818] ss:$24 sps:$4 sm:$0xff]  }
  0xe7   :  { %1992 = vmatpush1.bf16.msra.mxu1 %v2841_v4  ;;  %v2934_v4 = vld [vmem:[#allocation4 + $0x520] ss:$24 sps:$4 sm:$0xff]  }
  0xe8   :  { %2074 = vmatpush1.bf16.msra.mxu0 %v2844_v5  ;;  %1993 = vmatprep.subr.bf16.mxu1 %v2849_v6  ;;  %v2939_v5 = vld [vmem:[#allocation4 + $0x84c] ss:$24 sps:$4 sm:$0xff]  }
  0xe9   :  { %2075 = vmatprep.subr.bf16.mxu0 %v2852_v7  ;;  %v2942_v6 = vld [vmem:[#allocation4 + $0x554] ss:$24 sps:$4 sm:$0xff]   ;;  %v2937_v7 = vld [vmem:[#allocation4 + $0x848] ss:$24 sps:$4 sm:$0xff]  }
  0xeb   :  { %1994 = vmatpush1.bf16.msra.mxu1 %v2847_v10  ;;  %v2940_v10 = vld [vmem:[#allocation4 + $0x550] ss:$24 sps:$4 sm:$0xff]  }
  0xec   :  { %2076 = vmatpush1.bf16.msra.mxu0 %v2850_v11  ;;  %1995 = vmatprep.subr.bf16.mxu1 %v2855_v12  ;;  %v2945_v11 = vld [vmem:[#allocation4 + $0x87c] ss:$24 sps:$4 sm:$0xff]  }
  0xed   :  { %2077 = vmatprep.subr.bf16.mxu0 %v2858_v13  ;;  %v2948_v12 = vld [vmem:[#allocation4 + $0x584] ss:$24 sps:$4 sm:$0xff]   ;;  %v2943_v13 = vld [vmem:[#allocation4 + $0x878] ss:$24 sps:$4 sm:$0xff]  }
  0xef   :  { %1996 = vmatpush1.bf16.msra.mxu1 %v2853_v14  ;;  %v2946_v14 = vld [vmem:[#allocation4 + $0x580] ss:$24 sps:$4 sm:$0xff]  }
  0xf0   :  { %2078 = vmatpush1.bf16.msra.mxu0 %v2856_v15  ;;  %1997 = vmatprep.subr.bf16.mxu1 %v2861_v16  ;;  %v2951_v15 = vld [vmem:[#allocation4 + $0x8ac] ss:$24 sps:$4 sm:$0xff]  }
  0xf1   :  { %2079 = vmatprep.subr.bf16.mxu0 %v2864_v18  ;;  %v2954_v16 = vld [vmem:[#allocation4 + $0x5b4] ss:$24 sps:$4 sm:$0xff]   ;;  %v2949_v18 = vld [vmem:[#allocation4 + $0x8a8] ss:$24 sps:$4 sm:$0xff]  }
  0xf3   :  { %1998 = vmatpush1.bf16.msra.mxu1 %v2859_v19  ;;  %v2952_v19 = vld [vmem:[#allocation4 + $0x5b0] ss:$24 sps:$4 sm:$0xff]  }
  0xf4   :  { %2080 = vmatpush1.bf16.msra.mxu0 %v2862_v20  ;;  %2008 = vmatprep.subr.bf16.mxu1 %v2867_v21  ;;  %v2957_v20 = vld [vmem:[#allocation4 + $0x8dc] ss:$24 sps:$4 sm:$0xff]  }
  0xf5   :  { %2090 = vmatprep.subr.bf16.mxu0 %v2870_v22  ;;  %v2960_v21 = vld [vmem:[#allocation4 + $0x5e4] ss:$24 sps:$4 sm:$0xff]   ;;  %v2955_v22 = vld [vmem:[#allocation4 + $0x8d8] ss:$24 sps:$4 sm:$0xff]  }
  0xf6   :  { %2000 = vmatmul.mubr.bf16.vlgmr.msra.gmra.mrb[4].mxu1 %v3153_v9 }
  0xf7   :  { %2082 = vmatmul.mubr.bf16.vlgmr.msra.gmra.mrb[4].mxu0 %v3151_v8  ;;  %2009 = vmatpush1.bf16.msra.mxu1 %v2865_v23  ;;  %v2888_v8 = vld [vmem:[#allocation4 + $0x3a4] ss:$24 sps:$4 sm:$0xff]   ;;  %v2958_v23 = vld [vmem:[#allocation4 + $0x5e0] ss:$24 sps:$4 sm:$0xff]  }
  0xf8   :  { %2091 = vmatpush1.bf16.msra.mxu0 %v2868_v24  ;;  %2010 = vmatprep.subr.bf16.mxu1 %v2873_v25  ;;  %v2963_v24 = vld [vmem:[#allocation4 + $0x614] ss:$24 sps:$4 sm:$0xff]   ;;  %v2961_v25 = vld [vmem:[#allocation4 + $0x610] ss:$24 sps:$4 sm:$0xff]  }
  0xf9   :  { %2092 = vmatprep.subr.bf16.mxu0 %v2876_v26  ;;  %2040 = vmatprep.mubr.bf16.mxu1 %v3162_v40  ;;  %v2966_v26 = vld [vmem:[#allocation4 + $0x644] ss:$24 sps:$4 sm:$0xff]  }
  0xfa   :  { %2122 = vmatprep.mubr.bf16.mxu0 %v3147_v55  ;;  %v2892_v55 = vld [vmem:[#allocation4 + $0x3d0] ss:$24 sps:$4 sm:$0xff]  }
  0xfb   :  { %2011 = vmatpush1.bf16.msra.mxu1 %v2871_v27  ;;  %v2964_v27 = vld [vmem:[#allocation4 + $0x640] ss:$24 sps:$4 sm:$0xff]  }
  0xfc   :  { %2093 = vmatpush1.bf16.msra.mxu0 %v2874_v28  ;;  %2012 = vmatprep.subr.bf16.mxu1 %v2879_v29  ;;  %v2969_v28 = vld [vmem:[#allocation4 + $0x674] ss:$24 sps:$4 sm:$0xff]   ;;  %v2967_v29 = vld [vmem:[#allocation4 + $0x670] ss:$24 sps:$4 sm:$0xff]  }
  0xfd   :  { %2094 = vmatprep.subr.bf16.mxu0 %v2882_v30  ;;  %v2972_v30 = vld [vmem:[#allocation4 + $0x6a4] ss:$24 sps:$4 sm:$0xff]  }
  0xff   :  { %2013 = vmatpush1.bf16.msra.mxu1 %v2877_v31  ;;  %v2970_v31 = vld [vmem:[#allocation4 + $0x6a0] ss:$24 sps:$4 sm:$0xff]  }
 0x100   :  { %2095 = vmatpush1.bf16.msra.mxu0 %v2880_v32  ;;  %2014 = vmatprep.subr.bf16.mxu1 %v2885_v33  ;;  %v2975_v32 = vld [vmem:[#allocation4 + $0x6d4] ss:$24 sps:$4 sm:$0xff]   ;;  %v2973_v33 = vld [vmem:[#allocation4 + $0x6d0] ss:$24 sps:$4 sm:$0xff]  }
 0x101   :  { %2096 = vmatprep.subr.bf16.mxu0 %v2888_v8  ;;  %v2978_v8 = vld [vmem:[#allocation4 + $0x704] ss:$24 sps:$4 sm:$0xff]  }
 0x103   :  { %2015 = vmatpush1.bf16.msra.mxu1 %v2883_v34  ;;  %v2981_v34 = vld [vmem:[#allocation4 + $0x734] ss:$24 sps:$4 sm:$0xff]  }
 0x104   :  { %2097 = vmatpush1.bf16.msra.mxu0 %v2886_v54  ;;  %2016 = vmatprep.subr.bf16.mxu1 %v2891_v35  ;;  %v2979_v35 = vld [vmem:[#allocation4 + $0x730] ss:$24 sps:$4 sm:$0xff]  }
 0x105   :  { %2098 = vmatprep.subr.bf16.mxu0 %v2894_v36 }
 0x107   :  { %2017 = vmatpush1.bf16.msra.mxu1 %v2889_v37  ;;  %v2984_v37 = vld [vmem:[#allocation4 + $0x764] ss:$24 sps:$4 sm:$0xff]  }
 0x108   :  { %2099 = vmatpush1.bf16.msra.mxu0 %v2892_v55  ;;  %2018 = vmatprep.subr.bf16.mxu1 %v2897_v38  ;;  %v2982_v38 = vld [vmem:[#allocation4 + $0x760] ss:$24 sps:$4 sm:$0xff]  }
 0x109   :  { %2100 = vmatprep.subr.bf16.mxu0 %v2900_v39  ;;  %v2987_v39 = vld [vmem:[#allocation4 + $0x794] ss:$24 sps:$4 sm:$0xff]  }
 0x10b   :  { %2019 = vmatpush1.bf16.msra.mxu1 %v2895_v41  ;;  %v2985_v41 = vld [vmem:[#allocation4 + $0x790] ss:$24 sps:$4 sm:$0xff]  }
 0x10c   :  { %2101 = vmatpush1.bf16.msra.mxu0 %v2898_v42  ;;  %2020 = vmatprep.subr.bf16.mxu1 %v2903_v43  ;;  %v2990_v42 = vld [vmem:[#allocation4 + $0x7c4] ss:$24 sps:$4 sm:$0xff]   ;;  %v2988_v43 = vld [vmem:[#allocation4 + $0x7c0] ss:$24 sps:$4 sm:$0xff]  }
 0x10d   :  { %2102 = vmatprep.subr.bf16.mxu0 %v2906_v44  ;;  %v2993_v44 = vld [vmem:[#allocation4 + $0x7f4] ss:$24 sps:$4 sm:$0xff]  }
 0x10f   :  { %2021 = vmatpush1.bf16.msra.mxu1 %v2901_v45  ;;  %v2991_v45 = vld [vmem:[#allocation4 + $0x7f0] ss:$24 sps:$4 sm:$0xff]  }
 0x110   :  { %2103 = vmatpush1.bf16.msra.mxu0 %v2904_v46  ;;  %2022 = vmatprep.subr.bf16.mxu1 %v2909_v47  ;;  %v2996_v46 = vld [vmem:[#allocation4 + $0x824] ss:$24 sps:$4 sm:$0xff]   ;;  %v2994_v47 = vld [vmem:[#allocation4 + $0x820] ss:$24 sps:$4 sm:$0xff]  }
 0x111   :  { %2104 = vmatprep.subr.bf16.mxu0 %v2912_v48  ;;  %v2999_v48 = vld [vmem:[#allocation4 + $0x854] ss:$24 sps:$4 sm:$0xff]  }
 0x113   :  { %2023 = vmatpush1.bf16.msra.mxu1 %v2907_v49  ;;  %v2997_v49 = vld [vmem:[#allocation4 + $0x850] ss:$24 sps:$4 sm:$0xff]  }
 0x114   :  { %2105 = vmatpush1.bf16.msra.mxu0 %v2910_v50  ;;  %2024 = vmatprep.subr.bf16.mxu1 %v2915_v51  ;;  %v3002_v50 = vld [vmem:[#allocation4 + $0x884] ss:$24 sps:$4 sm:$0xff]   ;;  %v3000_v51 = vld [vmem:[#allocation4 + $0x880] ss:$24 sps:$4 sm:$0xff]  }
 0x115   :  { %2106 = vmatprep.subr.bf16.mxu0 %v2918_v52  ;;  %v3005_v52 = vld [vmem:[#allocation4 + $0x8b4] ss:$24 sps:$4 sm:$0xff]  }
 0x117   :  { %2025 = vmatpush1.bf16.msra.mxu1 %v2913_v53  ;;  %v3003_v53 = vld [vmem:[#allocation4 + $0x8b0] ss:$24 sps:$4 sm:$0xff]  }
 0x118   :  { %2107 = vmatpush1.bf16.msra.mxu0 %v2916_v56  ;;  %2026 = vmatprep.subr.bf16.mxu1 %v2921_v57  ;;  %v3008_v56 = vld [vmem:[#allocation4 + $0x8e4] ss:$24 sps:$4 sm:$0xff]   ;;  %v3006_v57 = vld [vmem:[#allocation4 + $0x8e0] ss:$24 sps:$4 sm:$0xff]  }
 0x119   :  { %2108 = vmatprep.subr.bf16.mxu0 %v2924_v58  ;;  %v2175_v58 = vlaneseq }
 0x11b   :  { %2027 = vmatpush1.bf16.msra.mxu1 %v2919_v59  ;;  %v2176_v59 = vshrl.u32 %v2175_v58, 7 }
 0x11c   :  { %2109 = vmatpush1.bf16.msra.mxu0 %v2922_v60  ;;  %2028 = vmatprep.subr.bf16.mxu1 %v2927_v61  ;;  %v2173_v61 = vld [vmem:[#allocation6] sm:$0x3f] }
 0x11d   :  { %2110 = vmatprep.subr.bf16.mxu0 %v2930_v62  ;;  %v2177_v60 = vsub.s32 0, %v2176_v59  ;;  %v2181_v62 = vsub.s32 1, %v2176_v59 }
 0x11f   :  { %2029 = vmatpush1.bf16.msra.mxu1 %v2925_v63  ;;  %v2178_v63 = vrot.slane %v2173_v61, %v2177_v60 }
 0x120   :  { %2111 = vmatpush1.bf16.msra.mxu0 %v2928_v0  ;;  %2030 = vmatprep.subr.bf16.mxu1 %v2933_v1  ;;  %v2182_v1 = vrot.slane %v2173_v61, %v2181_v62 }
 0x121   :  { %2112 = vmatprep.subr.bf16.mxu0 %v2936_v2 }
 0x123   :  { %2031 = vmatpush1.bf16.msra.mxu1 %v2931_v3 }
 0x124   :  { %2113 = vmatpush1.bf16.msra.mxu0 %v2934_v4  ;;  %2032 = vmatprep.subr.bf16.mxu1 %v2939_v5 }
 0x125   :  { %2114 = vmatprep.subr.bf16.mxu0 %v2942_v6 }
 0x127   :  { %2033 = vmatpush1.bf16.msra.mxu1 %v2937_v7 }
 0x128   :  { %2115 = vmatpush1.bf16.msra.mxu0 %v2940_v10  ;;  %2034 = vmatprep.subr.bf16.mxu1 %v2945_v11 }
 0x129   :  { %2116 = vmatprep.subr.bf16.mxu0 %v2948_v12 }
 0x12b   :  { %2035 = vmatpush1.bf16.msra.mxu1 %v2943_v13  ;;  %v3088_v13 = vmov 0.0  }
 0x12c   :  { %2117 = vmatpush1.bf16.msra.mxu0 %v2946_v14  ;;  %2036 = vmatprep.subr.bf16.mxu1 %v2951_v15  ;;  %56 = vst.msk [vmem:[%s3210_s3] sm:$0x7] %vm55_vm1, %v3088_v13  ;;  %v2185_v14 = vsub.s32 2, %v2176_v59  ;;  %v2189_v15 = vsub.s32 3, %v2176_v59 }
 0x12d   :  { %2118 = vmatprep.subr.bf16.mxu0 %v2954_v16 }
 0x12e   :  { %v2186_v16 = vrot.slane %v2173_v61, %v2185_v14 }
 0x12f   :  { %2037 = vmatpush1.bf16.msra.mxu1 %v2949_v18  ;;  %v2190_v18 = vrot.slane %v2173_v61, %v2189_v15 }
 0x130   :  { %2119 = vmatpush1.bf16.msra.mxu0 %v2952_v19  ;;  %2038 = vmatprep.subr.bf16.mxu1 %v2957_v20 }
 0x131   :  { %2120 = vmatprep.subr.bf16.mxu0 %v2960_v21 }
 0x133   :  { %2039 = vmatpush1.bf16.msra.mxu1 %v2955_v22 }
 0x134   :  { %2121 = vmatpush1.bf16.msra.mxu0 %v2958_v23 }
 0x135   :  { %2131 = vmatprep.subr.bf16.mxu0 %v2963_v24 }
 0x136   :  { %2041 = vmatmul.mubr.bf16.vlgmr.msra.gmra.mrb[4].mxu1 %v3167_v17 }
 0x137   :  { %2123 = vmatmul.mubr.bf16.vlgmr.msra.gmra.mrb[4].mxu0 %v3153_v9  ;;  %v2976_v9 = vld [vmem:[#allocation4 + $0x700] ss:$24 sps:$4 sm:$0xff]  }
 0x138   :  { %2132 = vmatpush1.bf16.msra.mxu0 %v2961_v25  ;;  %2163 = vmatprep.mubr.bf16.mxu0 %v3162_v40 }
 0x139   :  { %2133 = vmatprep.subr.bf16.mxu0 %v2966_v26 }
 0x13c   :  { %2134 = vmatpush1.bf16.msra.mxu0 %v2964_v27 }
 0x13d   :  { %2135 = vmatprep.subr.bf16.mxu0 %v2969_v28 }
 0x140   :  { %2136 = vmatpush1.bf16.msra.mxu0 %v2967_v29  ;;  %v2193_v29 = vsub.s32 4, %v2176_v59 }
 0x141   :  { %2137 = vmatprep.subr.bf16.mxu0 %v2972_v30  ;;  %v2197_v30 = vsub.s32 5, %v2176_v59 }
 0x144   :  { %2138 = vmatpush1.bf16.msra.mxu0 %v2970_v31  ;;  %v2194_v31 = vrot.slane %v2173_v61, %v2193_v29 }
 0x145   :  { %2139 = vmatprep.subr.bf16.mxu0 %v2975_v32  ;;  %v2198_v32 = vrot.slane %v2173_v61, %v2197_v30 }
 0x148   :  { %2140 = vmatpush1.bf16.msra.mxu0 %v2973_v33 }
 0x149   :  { %2141 = vmatprep.subr.bf16.mxu0 %v2978_v8  ;;  %v1837_v54 = vpop.f32.mrb[0].mxu1 }
 0x14a   :  { %v1839_v40 = vpop.f32.mrb[1].mxu1 }
 0x14b   :  { %v1841_v36 = vpop.f32.mrb[2].mxu1 }
 0x14c   :  { %2142 = vmatpush1.bf16.msra.mxu0 %v2976_v9  ;;  %v1842_v55 = vpop.f32.mrb[3].mxu1 }
 0x14d   :  { %2143 = vmatprep.subr.bf16.mxu0 %v2981_v34 }
 0x150   :  { %2144 = vmatpush1.bf16.msra.mxu0 %v2979_v35 }
 0x151   :  { %2145 = vmatprep.subr.bf16.mxu0 %v2984_v37 }
 0x154   :  { %2146 = vmatpush1.bf16.msra.mxu0 %v2982_v38  ;;  %v2172_v38 = vld [vmem:[%s3210_s3] sm:$0x7] }
 0x155   :  { %2147 = vmatprep.subr.bf16.mxu0 %v2987_v39 }
 0x158   :  { %2148 = vmatpush1.bf16.msra.mxu0 %v2985_v41 }
 0x159   :  { %2149 = vmatprep.subr.bf16.mxu0 %v2990_v42 }
 0x15c   :  { %2150 = vmatpush1.bf16.msra.mxu0 %v2988_v43 }
 0x15d   :  { %2151 = vmatprep.subr.bf16.mxu0 %v2993_v44 }
 0x160   :  { %2152 = vmatpush1.bf16.msra.mxu0 %v2991_v45 }
 0x161   :  { %2153 = vmatprep.subr.bf16.mxu0 %v2996_v46 }
 0x164   :  { %2154 = vmatpush1.bf16.msra.mxu0 %v2994_v47 }
 0x165   :  { %2155 = vmatprep.subr.bf16.mxu0 %v2999_v48 }
 0x168   :  { %2156 = vmatpush1.bf16.msra.mxu0 %v2997_v49 }
 0x169   :  { %2157 = vmatprep.subr.bf16.mxu0 %v3002_v50 }
 0x16c   :  { %2158 = vmatpush1.bf16.msra.mxu0 %v3000_v51 }
 0x16d   :  { %2159 = vmatprep.subr.bf16.mxu0 %v3005_v52 }
 0x170   :  { %2160 = vmatpush1.bf16.msra.mxu0 %v3003_v53 }
 0x171   :  { %2161 = vmatprep.subr.bf16.mxu0 %v3008_v56 }
 0x174   :  { %2162 = vmatpush1.bf16.msra.mxu0 %v3006_v57 }
 0x177   :  { %2164 = vmatmul.mubr.bf16.vlgmr.msra.gmra.mrb[4].mxu0 %v3167_v17 }
 0x18a   :  { %v1919_v0 = vpop.f32.mrb[0].mxu0 }
 0x18b   :  { %v2546_v2 = vadd.f32 %v1919_v0, %v1837_v54  ;;  %v1921_v3 = vpop.f32.mrb[1].mxu0 }
 0x18c   :  { %v2547_v4 = vadd.f32 %v1921_v3, %v1839_v40  ;;  %v1923_v5 = vpop.f32.mrb[2].mxu0 }
 0x18d   :  { %v2205_v6 = vmul.f32 %v2546_v2, %v2178_v63  ;;  %v1924_v7 = vpop.f32.mrb[3].mxu0 }
 0x18e   :  { %v2206_v10 = vmul.f32 %v2547_v4, %v2182_v1 }
 0x18f   :  { %v2212_v11 = vsel %vm2211_vm0, %v2205_v6, 0.0 }
 0x190   :  { %v2213_v17 = vsel %vm2211_vm0, %v2206_v10, 0.0 }
 0x191   :  { %v2214_v12 = vadd.f32 %v2213_v17, %v2212_v11 }
 0x209   :  { %v2042_v19 = vpop.f32.mrb[4].mxu1 }
 0x20a   :  { %v2207_v20 = vmul.f32 %v2186_v16, %v2042_v19  ;;  %v2044_v21 = vpop.f32.mrb[5].mxu1 }
 0x20b   :  { %v2208_v22 = vmul.f32 %v2190_v18, %v2044_v21  ;;  %v2046_v23 = vpop.f32.mrb[6].mxu1 }
 0x20c   :  { %v2215_v24 = vsel %vm2211_vm0, %v2207_v20, 0.0  ;;  %v2047_v25 = vpop.f32.mrb[7].mxu1 }
 0x20d   :  { %v2216_v26 = vadd.f32 %v2215_v24, %v2214_v12  ;;  %v2217_v27 = vsel %vm2211_vm0, %v2208_v22, 0.0 }
 0x20f   :  { %v2218_v28 = vadd.f32 %v2217_v27, %v2216_v26 }
 0x24a   :  { %v2165_v33 = vpop.f32.mrb[4].mxu0 }
 0x24b   :  { %v2209_v8 = vmul.f32 %v2194_v31, %v2165_v33  ;;  %v2167_v9 = vpop.f32.mrb[5].mxu0 }
 0x24c   :  { %v2210_v34 = vmul.f32 %v2198_v32, %v2167_v9  ;;  %v2169_v54 = vpop.f32.mrb[6].mxu0 }
 0x24d   :  { %v2219_v40 = vsel %vm2211_vm0, %v2209_v8, 0.0  ;;  %v2170_v35 = vpop.f32.mrb[7].mxu0 }
 0x24e   :  { %v2220_v36 = vadd.f32 %v2219_v40, %v2218_v28  ;;  %v2221_v37 = vsel %vm2211_vm0, %v2210_v34, 0.0 }
 0x250   :  { %v2222_v55 = vadd.f32 %v2221_v37, %v2220_v36 }
 0x252   :  { %2223 = vadd.xlane.f32.xlu0 %v2222_v55 }
 0x2df   :  { %v2224_v39 = vpop.xlane.xlu0 %2223 }
 0x2e0   :  { %v2225_v41 = vadd.f32 %v2224_v39, %v2172_v38 }
 0x2e2   :  { %2227 = vst.msk [vmem:[%s3210_s3] sm:$0x7] %vm55_vm1, %v2225_v41 }
 0x2e9   :  { %v2231_v42 = vld [vmem:[%s3210_s3] sm:$0x7] }
 0x2ea   :  { %v2232_v43 = vsel %vm55_vm1, %v2231_v42, -inf }
 0x2eb   :  { %v2233_v44 = vrot.slane %v2232_v43, 4 }
 0x2ed   :  { %v2234_v45 = vmax.f32 %v2232_v43, %v2233_v44 }
 0x2ef   :  { %v2235_v46 = vrot.slane %v2234_v45, 2 }
 0x2f1   :  { %v2236_v47 = vmax.f32 %v2234_v45, %v2235_v46 }
 0x2f3   :  { %v2237_v48 = vrot.slane %v2236_v47, 1 }
 0x2f5   :  { %v2238_v49 = vmax.f32 %v2236_v47, %v2237_v48 }
 0x2f7   :  { %v2239_v50 = vsub.f32 %v2231_v42, %v2238_v49 }
 0x2f9   :  { %v2240_v51 = vmul.f32 1.442695, %v2239_v50 }
 0x2fb   :  { %3009 = vpow2.f32 %v2240_v51 }
 0x305   :  { %v3010_v52 = vpop.eup %3009 }
 0x306   :  { %v2242_v53 = vsel %vm55_vm1, %v3010_v52, 0.0 }
 0x307   :  { %v2243_v56 = vrot.slane %v2242_v53, 4 }
 0x309   :  { %v2244_v57 = vadd.f32 %v2243_v56, %v2242_v53 }
 0x30b   :  { %v2245_v58 = vrot.slane %v2244_v57, 2 }
 0x30d   :  { %v2246_v59 = vadd.f32 %v2245_v58, %v2244_v57 }
 0x30f   :  { %v2247_v60 = vrot.slane %v2246_v59, 1 }
 0x311   :  { %v2248_v61 = vadd.f32 %v2247_v60, %v2246_v59 }
 0x313   :  { %3011 = vrcp.f32 %v2248_v61 }
 0x31d   :  { %v3012_v62 = vpop.eup %3011 }
 0x31e   :  { %v2250_v63 = vmul.f32 %v3012_v62, %v3010_v52 }
 0x320   :  { %2251 = vst.msk [vmem:[%s3210_s3] sm:$0x7] %vm55_vm1, %v2250_v63 }
 0x321   :  { %2256 = vsyncpa [#allocation3], 1 }
 0x322   :  { %2257 = vsyncpa [#allocation5], 1 }

</bundles_post_ra>
